<compile_context>
chip_gen: v7x
topology: tpu7x:2x2x1
jax: 0.10.0
libtpu: 0.0.40
codegen_flags: <defaults>
</compile_context>

<pallas_src>
import functools

import jax
import jax.numpy as jnp
from jax import lax
from jax.experimental import pallas as pl
from jax.experimental.pallas import tpu as pltpu


# ----------------------------------------------------------------------------
# In-kernel layer math (pure function, traced inside the single fused kernel)
# ----------------------------------------------------------------------------
def _gat_layer(h_in, w, a_dst_mat, a_srcT_mat, coeff, bias, adj, eattr,
               hmask_full=None, *, heads, apply_relu):
    """One dense GATConv layer (PyG semantics, add_self_loops=False, concat=True).

    h_in       : [N, Fin]      input node features
    w          : [Fin, H*C]    lin weight (bias=False)
    a_dst_mat  : [H*C, H]      block-diagonal att_dst (col h nonzero on rows h*C:(h+1)*C)
    a_srcT_mat : [H, H*C]      block-diagonal att_src (row h nonzero on cols h*C:(h+1)*C)
    coeff      : [H, 1]        (lin_edge * att_edge).sum(-1)   (edge_dim == 1)
    bias       : [1, H*C]
    adj        : [N, N]        (dst, src) 0/1 mask
    eattr      : [N, N]        (dst, src) edge attribute value
    hmask_full : [H*N, H*C]    row h*N+i is 1 on head h's own column block (heads>1 only)
    returns    : [N, H*C]
    """
    n = h_in.shape[0]

    # Node linear transform: [N, H*C]
    h = jnp.dot(h_in, w, preferred_element_type=jnp.float32)

    # Head-batched per-node attention logits (two matmuls for all heads).
    #   a_dst_all[i, h]  = sum_c h[i, h*C+c] * att_dst[h, c]     -> [N, H]
    #   a_srcT_all[h, j] = sum_c h[j, h*C+c] * att_src[h, c]     -> [H, N]
    a_dst_all = jnp.dot(h, a_dst_mat, preferred_element_type=jnp.float32)
    a_srcT_all = lax.dot_general(a_srcT_mat, h, (((1,), (1,)), ((), ())),
                                 preferred_element_type=jnp.float32)

    if heads == 1:
        # Single-head fast path: no stacking, no head mask, no block-sum.
        e = a_dst_all + a_srcT_all + coeff[0:1, 0:1] * eattr        # [N, N]
        adj_st = adj
    else:
        # Edge logits stacked along sublanes: e[h*N + i, j].
        e_blocks = []
        for hd in range(heads):        # heads is a small static int -> unrolled
            e_blocks.append(a_dst_all[:, hd:hd + 1]                 # [N, 1]
                            + a_srcT_all[hd:hd + 1, :]              # [1, N]
                            + coeff[hd:hd + 1, 0:1] * eattr)        # [N, N]
        e = jnp.concatenate(e_blocks, axis=0)                       # [H*N, N]
        adj_st = jnp.concatenate([adj] * heads, axis=0)             # [H*N, N]

    # leaky_relu(negative_slope=0.2), restrict softmax to real edges.
    e = jnp.where(e >= 0.0, e, 0.2 * e)
    e = jnp.where(adj_st > 0.5, e, -1e30)

    # Masked softmax over source nodes (lane axis), all heads at once.
    # Nodes with no incoming edges get an all-zero row (matches PyG empty scatter).
    m = jnp.max(e, axis=-1, keepdims=True)
    p = jnp.exp(e - m) * adj_st        # keep adj multiply: isolated rows -> exactly 0
    denom = jnp.sum(p, axis=-1, keepdims=True)
    alpha = p * pl.reciprocal(jnp.maximum(denom, 1e-16), approx=True)

    # Aggregation: one lane-dense matmul against the full-width h.
    o_all = jnp.dot(alpha, h, preferred_element_type=jnp.float32)   # [H*N, H*C]
    if heads == 1:
        out = o_all
    else:
        # Keep each head's own column block and sum the head blocks.
        o_all = o_all * hmask_full
        out = o_all[0:n, :]
        for hd in range(1, heads):
            out = out + o_all[hd * n:(hd + 1) * n, :]
    out = out + bias                                                 # [N, H*C]
    if apply_relu:
        out = jnp.maximum(out, 0.0)
    return out


# ----------------------------------------------------------------------------
# Fused kernel: layer0 -> ReLU -> layer1 -> mean-pool -> Linear(out, 1)
# ----------------------------------------------------------------------------
def _fused_gat_kernel(x_ref, adj_ref, eattr_ref,
                      w0_ref, ad0_ref, as0_ref, c0_ref, b0_ref, hm0_ref,
                      w1_ref, ad1_ref, as1_ref, c1_ref, b1_ref,
                      pw_ref, pb_ref, out_ref, *, heads0, inv_n):
    adj = adj_ref[...]
    eattr = eattr_ref[...]

    # Layer 0: GATConv(in_ch, hidden//heads, heads=4, edge_dim=1) + ReLU
    # (dropout p=0.0 -> identity, skipped)
    h = _gat_layer(x_ref[...], w0_ref[...], ad0_ref[...], as0_ref[...],
                   c0_ref[...], b0_ref[...], adj, eattr,
                   hmask_full=hm0_ref[...], heads=heads0, apply_relu=True)
    # Layer 1 (last): GATConv(hidden, out_channels, heads=1, edge_dim=1), no ReLU
    h = _gat_layer(h, w1_ref[...], ad1_ref[...], as1_ref[...],
                   c1_ref[...], b1_ref[...], adj, eattr,
                   heads=1, apply_relu=False)

    # batch=None readout: mean over nodes, then Linear(out_channels, 1).
    mean = jnp.sum(h, axis=0, keepdims=True) * inv_n                 # [1, out_ch]
    out_ref[...] = (jnp.dot(mean, pw_ref[...],
                            preferred_element_type=jnp.float32) + pb_ref[...])


# ----------------------------------------------------------------------------
# Wrappers / parameter packing
# ----------------------------------------------------------------------------
_VMEM = pl.BlockSpec(memory_space=pltpu.MemorySpace.VMEM)


def pack_gat_layer(raw, heads, out_ch, n_nodes):
    """Convert PyG-style GATConv params into the kernel's head-batched form."""
    H, C = heads, out_ch
    eye = jnp.eye(H, dtype=jnp.float32)
    # a_dst_mat[h*C + c, g] = att_dst[h, c] * (h == g)
    a_dst_mat = (raw["att_dst"][:, :, None] * eye[:, None, :]).reshape(H * C, H)
    # a_srcT_mat[g, h*C + c] = att_src[h, c] * (h == g)
    a_srcT_mat = (eye[:, :, None] * raw["att_src"][None, :, :]).reshape(H, H * C)
    packed = {
        "w": raw["w"],                                                   # [Fin, H*C]
        "a_dst": a_dst_mat,
        "a_srcT": a_srcT_mat,
        "coeff": jnp.sum(raw["lin_edge"] * raw["att_edge"],
                         axis=-1, keepdims=True),                        # [H, 1]
        "bias": raw["bias"],                                             # [1, H*C]
    }
    if H > 1:
        # head mask replicated over the node axis: [H*N, H*C]
        hmask = jnp.repeat(eye, C, axis=1)                  # [H, H*C]
        packed["hmask"] = jnp.repeat(hmask, n_nodes, axis=0)
    return packed


def multilayer_gat_forward(x, adj, eattr, params, heads):
    n = x.shape[0]
    l0, l1 = params["l0"], params["l1"]
    kernel = functools.partial(_fused_gat_kernel, heads0=heads, inv_n=1.0 / n)
    out = pl.pallas_call(
        kernel,
        out_shape=jax.ShapeDtypeStruct((1, 1), jnp.float32),
        in_specs=[_VMEM] * 16,
        out_specs=_VMEM,
    )(x, adj, eattr,
      l0["w"], l0["a_dst"], l0["a_srcT"], l0["coeff"], l0["bias"], l0["hmask"],
      l1["w"], l1["a_dst"], l1["a_srcT"], l1["coeff"], l1["bias"],
      params["pred_w"], params["pred_b"])
    # matches torch: pred(x.mean(0, keepdim=True)).squeeze(-1) -> shape [1]
    return out.reshape(1)


# ----------------------------------------------------------------------------
# Deterministic parameter / input construction
# ----------------------------------------------------------------------------
def init_gat_conv(key, fin, heads, out_ch, scale=0.3):
    ks = jax.random.split(key, 6)
    return {
        "w": scale * jax.random.normal(ks[0], (fin, heads * out_ch), jnp.float32),
        "att_src": scale * jax.random.normal(ks[1], (heads, out_ch), jnp.float32),
        "att_dst": scale * jax.random.normal(ks[2], (heads, out_ch), jnp.float32),
        "att_edge": scale * jax.random.normal(ks[3], (heads, out_ch), jnp.float32),
        # lin_edge: Linear(edge_dim=1, heads*out_ch, bias=False) reshaped to [heads, out_ch]
        "lin_edge": scale * jax.random.normal(ks[4], (heads, out_ch), jnp.float32),
        "bias": scale * jax.random.normal(ks[5], (1, heads * out_ch), jnp.float32),
    }


if __name__ == "__main__":
    N = 16            # nodes
    IN_CH = 8
    HIDDEN = 32
    HEADS = 4
    OUT_CH = 16
    # num_layers = 2 (default): [GATConv(in, hidden//heads, heads=4), GATConv(hidden, out, heads=1)]

    key = jax.random.PRNGKey(0)
    kx, ke, k0, k1, kp = jax.random.split(key, 5)

    # Node features
    x = jax.random.normal(kx, (N, IN_CH), jnp.float32)

    # Deterministic edge list (COO): node i receives edges from (i+1), (i+3), (i+5) mod N.
    src, dst = [], []
    for i in range(N):
        for off in (1, 3, 5):
            src.append((i + off) % N)
            dst.append(i)
    edge_index = jnp.array([src, dst], dtype=jnp.int32)          # [2, E]
    E = edge_index.shape[1]
    edge_attr = jax.random.normal(ke, (E, 1), jnp.float32)       # edge_dim = 1

    # Glue: COO -> dense adjacency / edge-attr maps (indexed [dst, src]).
    src_idx, dst_idx = edge_index[0], edge_index[1]
    adj = jnp.zeros((N, N), jnp.float32).at[dst_idx, src_idx].set(1.0)
    eattr = jnp.zeros((N, N), jnp.float32).at[dst_idx, src_idx].set(edge_attr[:, 0])

    raw0 = init_gat_conv(k0, IN_CH, HEADS, HIDDEN // HEADS)
    raw1 = init_gat_conv(k1, HIDDEN, 1, OUT_CH)
    params = {
        "l0": pack_gat_layer(raw0, HEADS, HIDDEN // HEADS, N),
        "l1": pack_gat_layer(raw1, 1, OUT_CH, N),
        # pred: Linear(OUT_CH, 1) — weight stored pre-transposed as [OUT_CH, 1]
        "pred_w": 0.3 * jax.random.normal(kp, (OUT_CH, 1), jnp.float32),
        "pred_b": jnp.full((1, 1), 0.1, jnp.float32),
    }

    # TODO(synk): batched (batch != None) readout path is a data-dependent per-graph
    # loop in the reference; only the batch=None path is implemented here.

    out = multilayer_gat_forward(x, adj, eattr, params, HEADS)
    out = jax.block_until_ready(out)
    assert out.shape == (1,), out.shape
    assert bool(jnp.all(jnp.isfinite(out)))
    print("KERNEL_OK")
</pallas_src>

<mosaic_0001>
module attributes {stable_mosaic.version = 11 : i64} {
  func.func @_fused_gat_kernel(%arg0: memref<16x8xf32, #tpu.memory_space<vmem>>, %arg1: memref<16x16xf32, #tpu.memory_space<vmem>>, %arg2: memref<16x16xf32, #tpu.memory_space<vmem>>, %arg3: memref<8x32xf32, #tpu.memory_space<vmem>>, %arg4: memref<32x4xf32, #tpu.memory_space<vmem>>, %arg5: memref<4x32xf32, #tpu.memory_space<vmem>>, %arg6: memref<4x1xf32, #tpu.memory_space<vmem>>, %arg7: memref<1x32xf32, #tpu.memory_space<vmem>>, %arg8: memref<64x32xf32, #tpu.memory_space<vmem>>, %arg9: memref<32x16xf32, #tpu.memory_space<vmem>>, %arg10: memref<16x1xf32, #tpu.memory_space<vmem>>, %arg11: memref<1x16xf32, #tpu.memory_space<vmem>>, %arg12: memref<1x1xf32, #tpu.memory_space<vmem>>, %arg13: memref<1x16xf32, #tpu.memory_space<vmem>>, %arg14: memref<16x1xf32, #tpu.memory_space<vmem>>, %arg15: memref<1x1xf32, #tpu.memory_space<vmem>>, %arg16: memref<1x1xf32, #tpu.memory_space<vmem>>) attributes {dimension_semantics = [], scalar_prefetch = 0 : i64, scratch_operands = 0 : i64, tpu.core_type = #tpu.core_type<tc>} {
    %c0 = arith.constant 0 : index
    %c0_0 = arith.constant 0 : index
    %0 = vector.load %arg1[%c0, %c0_0] : memref<16x16xf32, #tpu.memory_space<vmem>>, vector<16x16xf32>
    %c0_1 = arith.constant 0 : index
    %c0_2 = arith.constant 0 : index
    %1 = vector.load %arg2[%c0_1, %c0_2] : memref<16x16xf32, #tpu.memory_space<vmem>>, vector<16x16xf32>
    %c0_3 = arith.constant 0 : index
    %c0_4 = arith.constant 0 : index
    %2 = vector.load %arg0[%c0_3, %c0_4] : memref<16x8xf32, #tpu.memory_space<vmem>>, vector<16x8xf32>
    %c0_5 = arith.constant 0 : index
    %c0_6 = arith.constant 0 : index
    %3 = vector.load %arg3[%c0_5, %c0_6] : memref<8x32xf32, #tpu.memory_space<vmem>>, vector<8x32xf32>
    %c0_7 = arith.constant 0 : index
    %c0_8 = arith.constant 0 : index
    %4 = vector.load %arg4[%c0_7, %c0_8] : memref<32x4xf32, #tpu.memory_space<vmem>>, vector<32x4xf32>
    %c0_9 = arith.constant 0 : index
    %c0_10 = arith.constant 0 : index
    %5 = vector.load %arg5[%c0_9, %c0_10] : memref<4x32xf32, #tpu.memory_space<vmem>>, vector<4x32xf32>
    %c0_11 = arith.constant 0 : index
    %c0_12 = arith.constant 0 : index
    %6 = vector.load %arg6[%c0_11, %c0_12] : memref<4x1xf32, #tpu.memory_space<vmem>>, vector<4x1xf32>
    %c0_13 = arith.constant 0 : index
    %c0_14 = arith.constant 0 : index
    %7 = vector.load %arg7[%c0_13, %c0_14] : memref<1x32xf32, #tpu.memory_space<vmem>>, vector<1x32xf32>
    %c0_15 = arith.constant 0 : index
    %c0_16 = arith.constant 0 : index
    %8 = vector.load %arg8[%c0_15, %c0_16] : memref<64x32xf32, #tpu.memory_space<vmem>>, vector<64x32xf32>
    %cst = arith.constant dense<0.000000e+00> : vector<16x32xf32>
    %9 = tpu.matmul %2, %3, %cst {dimension_numbers = #tpu.dot_dimension_numbers<[1], [0], [0], [1], [0, 0, 1, 1], [], []>} : vector<16x8xf32>, vector<8x32xf32>, vector<16x32xf32> -> vector<16x32xf32>
    %cst_17 = arith.constant dense<0.000000e+00> : vector<16x4xf32>
    %10 = tpu.matmul %9, %4, %cst_17 {dimension_numbers = #tpu.dot_dimension_numbers<[1], [0], [0], [1], [0, 0, 1, 1], [], []>} : vector<16x32xf32>, vector<32x4xf32>, vector<16x4xf32> -> vector<16x4xf32>
    %cst_18 = arith.constant dense<0.000000e+00> : vector<4x16xf32>
    %11 = tpu.matmul %5, %9, %cst_18 {dimension_numbers = #tpu.dot_dimension_numbers<[1], [1], [0], [0], [0, 0, 1, 0], [], []>} : vector<4x32xf32>, vector<16x32xf32>, vector<4x16xf32> -> vector<4x16xf32>
    %12 = vector.extract_strided_slice %10 {offsets = [0, 0], sizes = [16, 1], strides = [1, 1]} : vector<16x4xf32> to vector<16x1xf32>
    %13 = vector.extract_strided_slice %11 {offsets = [0, 0], sizes = [1, 16], strides = [1, 1]} : vector<4x16xf32> to vector<1x16xf32>
    %14 = vector.broadcast %12 : vector<16x1xf32> to vector<16x16xf32>
    %15 = vector.broadcast %13 : vector<1x16xf32> to vector<16x16xf32>
    %16 = arith.addf %14, %15 : vector<16x16xf32>
    %17 = vector.extract_strided_slice %6 {offsets = [0, 0], sizes = [1, 1], strides = [1, 1]} : vector<4x1xf32> to vector<1x1xf32>
    %18 = vector.broadcast %17 : vector<1x1xf32> to vector<16x16xf32>
    %19 = arith.mulf %18, %1 : vector<16x16xf32>
    %20 = arith.addf %16, %19 : vector<16x16xf32>
    %21 = vector.extract_strided_slice %10 {offsets = [0, 1], sizes = [16, 1], strides = [1, 1]} : vector<16x4xf32> to vector<16x1xf32>
    %22 = vector.extract_strided_slice %11 {offsets = [1, 0], sizes = [1, 16], strides = [1, 1]} : vector<4x16xf32> to vector<1x16xf32>
    %23 = vector.broadcast %21 : vector<16x1xf32> to vector<16x16xf32>
    %24 = vector.broadcast %22 : vector<1x16xf32> to vector<16x16xf32>
    %25 = arith.addf %23, %24 : vector<16x16xf32>
    %26 = vector.extract_strided_slice %6 {offsets = [1, 0], sizes = [1, 1], strides = [1, 1]} : vector<4x1xf32> to vector<1x1xf32>
    %27 = vector.broadcast %26 : vector<1x1xf32> to vector<16x16xf32>
    %28 = arith.mulf %27, %1 : vector<16x16xf32>
    %29 = arith.addf %25, %28 : vector<16x16xf32>
    %30 = vector.extract_strided_slice %10 {offsets = [0, 2], sizes = [16, 1], strides = [1, 1]} : vector<16x4xf32> to vector<16x1xf32>
    %31 = vector.extract_strided_slice %11 {offsets = [2, 0], sizes = [1, 16], strides = [1, 1]} : vector<4x16xf32> to vector<1x16xf32>
    %32 = vector.broadcast %30 : vector<16x1xf32> to vector<16x16xf32>
    %33 = vector.broadcast %31 : vector<1x16xf32> to vector<16x16xf32>
    %34 = arith.addf %32, %33 : vector<16x16xf32>
    %35 = vector.extract_strided_slice %6 {offsets = [2, 0], sizes = [1, 1], strides = [1, 1]} : vector<4x1xf32> to vector<1x1xf32>
    %36 = vector.broadcast %35 : vector<1x1xf32> to vector<16x16xf32>
    %37 = arith.mulf %36, %1 : vector<16x16xf32>
    %38 = arith.addf %34, %37 : vector<16x16xf32>
    %39 = vector.extract_strided_slice %10 {offsets = [0, 3], sizes = [16, 1], strides = [1, 1]} : vector<16x4xf32> to vector<16x1xf32>
    %40 = vector.extract_strided_slice %11 {offsets = [3, 0], sizes = [1, 16], strides = [1, 1]} : vector<4x16xf32> to vector<1x16xf32>
    %41 = vector.broadcast %39 : vector<16x1xf32> to vector<16x16xf32>
    %42 = vector.broadcast %40 : vector<1x16xf32> to vector<16x16xf32>
    %43 = arith.addf %41, %42 : vector<16x16xf32>
    %44 = vector.extract_strided_slice %6 {offsets = [3, 0], sizes = [1, 1], strides = [1, 1]} : vector<4x1xf32> to vector<1x1xf32>
    %45 = vector.broadcast %44 : vector<1x1xf32> to vector<16x16xf32>
    %46 = arith.mulf %45, %1 : vector<16x16xf32>
    %47 = arith.addf %43, %46 : vector<16x16xf32>
    %48 = tpu.concatenate %20, %29, %38, %47 in 0 : vector<16x16xf32>, vector<16x16xf32>, vector<16x16xf32>, vector<16x16xf32> -> vector<64x16xf32>
    %49 = tpu.concatenate %0, %0, %0, %0 in 0 : vector<16x16xf32>, vector<16x16xf32>, vector<16x16xf32>, vector<16x16xf32> -> vector<64x16xf32>
    %cst_19 = arith.constant 0.000000e+00 : f32
    %50 = vector.broadcast %cst_19 : f32 to vector<64x16xf32>
    %51 = arith.cmpf oge, %48, %50 : vector<64x16xf32>
    %cst_20 = arith.constant 2.000000e-01 : f32
    %52 = vector.broadcast %cst_20 : f32 to vector<64x16xf32>
    %53 = arith.mulf %52, %48 : vector<64x16xf32>
    %54 = arith.select %51, %48, %53 : vector<64x16xi1>, vector<64x16xf32>
    %cst_21 = arith.constant 5.000000e-01 : f32
    %55 = vector.broadcast %cst_21 : f32 to vector<64x16xf32>
    %56 = arith.cmpf ogt, %49, %55 : vector<64x16xf32>
    %cst_22 = arith.constant -1.000000e+30 : f32
    %57 = vector.broadcast %cst_22 : f32 to vector<64x16xf32>
    %58 = arith.select %56, %54, %57 : vector<64x16xi1>, vector<64x16xf32>
    %cst_23 = arith.constant dense<0xFF800000> : vector<64xf32>
    %59 = vector.multi_reduction <maximumf>, %58, %cst_23 [1] : vector<64x16xf32> to vector<64xf32>
    %60 = vector.shape_cast %59 : vector<64xf32> to vector<64x1xf32>
    %61 = vector.broadcast %60 : vector<64x1xf32> to vector<64x16xf32>
    %62 = arith.subf %58, %61 : vector<64x16xf32>
    %63 = math.exp %62 : vector<64x16xf32>
    %64 = arith.mulf %63, %49 : vector<64x16xf32>
    %cst_24 = arith.constant dense<0.000000e+00> : vector<64xf32>
    %65 = vector.multi_reduction <add>, %64, %cst_24 [1] : vector<64x16xf32> to vector<64xf32>
    %66 = vector.shape_cast %65 : vector<64xf32> to vector<64x1xf32>
    %cst_25 = arith.constant 1.000000e-16 : f32
    %67 = vector.broadcast %cst_25 : f32 to vector<64x1xf32>
    %68 = arith.maximumf %66, %67 : vector<64x1xf32>
    %69 = tpu.reciprocal %68 {approx = true} : vector<64x1xf32> -> vector<64x1xf32>
    %70 = vector.broadcast %69 : vector<64x1xf32> to vector<64x16xf32>
    %71 = arith.mulf %64, %70 : vector<64x16xf32>
    %cst_26 = arith.constant dense<0.000000e+00> : vector<64x32xf32>
    %72 = tpu.matmul %71, %9, %cst_26 {dimension_numbers = #tpu.dot_dimension_numbers<[1], [0], [0], [1], [0, 0, 1, 1], [], []>} : vector<64x16xf32>, vector<16x32xf32>, vector<64x32xf32> -> vector<64x32xf32>
    %73 = arith.mulf %72, %8 : vector<64x32xf32>
    %74 = vector.extract_strided_slice %73 {offsets = [0, 0], sizes = [16, 32], strides = [1, 1]} : vector<64x32xf32> to vector<16x32xf32>
    %75 = vector.extract_strided_slice %73 {offsets = [16, 0], sizes = [16, 32], strides = [1, 1]} : vector<64x32xf32> to vector<16x32xf32>
    %76 = arith.addf %74, %75 : vector<16x32xf32>
    %77 = vector.extract_strided_slice %73 {offsets = [32, 0], sizes = [16, 32], strides = [1, 1]} : vector<64x32xf32> to vector<16x32xf32>
    %78 = arith.addf %76, %77 : vector<16x32xf32>
    %79 = vector.extract_strided_slice %73 {offsets = [48, 0], sizes = [16, 32], strides = [1, 1]} : vector<64x32xf32> to vector<16x32xf32>
    %80 = arith.addf %78, %79 : vector<16x32xf32>
    %81 = vector.broadcast %7 : vector<1x32xf32> to vector<16x32xf32>
    %82 = arith.addf %80, %81 : vector<16x32xf32>
    %cst_27 = arith.constant 0.000000e+00 : f32
    %83 = vector.broadcast %cst_27 : f32 to vector<16x32xf32>
    %84 = arith.maximumf %82, %83 : vector<16x32xf32>
    %c0_28 = arith.constant 0 : index
    %c0_29 = arith.constant 0 : index
    %85 = vector.load %arg9[%c0_28, %c0_29] : memref<32x16xf32, #tpu.memory_space<vmem>>, vector<32x16xf32>
    %c0_30 = arith.constant 0 : index
    %c0_31 = arith.constant 0 : index
    %86 = vector.load %arg10[%c0_30, %c0_31] : memref<16x1xf32, #tpu.memory_space<vmem>>, vector<16x1xf32>
    %c0_32 = arith.constant 0 : index
    %c0_33 = arith.constant 0 : index
    %87 = vector.load %arg11[%c0_32, %c0_33] : memref<1x16xf32, #tpu.memory_space<vmem>>, vector<1x16xf32>
    %c0_34 = arith.constant 0 : index
    %c0_35 = arith.constant 0 : index
    %88 = vector.load %arg12[%c0_34, %c0_35] : memref<1x1xf32, #tpu.memory_space<vmem>>, vector<1x1xf32>
    %c0_36 = arith.constant 0 : index
    %c0_37 = arith.constant 0 : index
    %89 = vector.load %arg13[%c0_36, %c0_37] : memref<1x16xf32, #tpu.memory_space<vmem>>, vector<1x16xf32>
    %cst_38 = arith.constant dense<0.000000e+00> : vector<16x16xf32>
    %90 = tpu.matmul %84, %85, %cst_38 {dimension_numbers = #tpu.dot_dimension_numbers<[1], [0], [0], [1], [0, 0, 1, 1], [], []>} : vector<16x32xf32>, vector<32x16xf32>, vector<16x16xf32> -> vector<16x16xf32>
    %cst_39 = arith.constant dense<0.000000e+00> : vector<16x1xf32>
    %91 = tpu.matmul %90, %86, %cst_39 {dimension_numbers = #tpu.dot_dimension_numbers<[1], [0], [0], [1], [0, 0, 1, 1], [], []>} : vector<16x16xf32>, vector<16x1xf32>, vector<16x1xf32> -> vector<16x1xf32>
    %cst_40 = arith.constant dense<0.000000e+00> : vector<1x16xf32>
    %92 = tpu.matmul %87, %90, %cst_40 {dimension_numbers = #tpu.dot_dimension_numbers<[1], [1], [0], [0], [0, 0, 1, 0], [], []>} : vector<1x16xf32>, vector<16x16xf32>, vector<1x16xf32> -> vector<1x16xf32>
    %93 = vector.broadcast %91 : vector<16x1xf32> to vector<16x16xf32>
    %94 = vector.broadcast %92 : vector<1x16xf32> to vector<16x16xf32>
    %95 = arith.addf %93, %94 : vector<16x16xf32>
    %96 = vector.broadcast %88 : vector<1x1xf32> to vector<16x16xf32>
    %97 = arith.mulf %96, %1 : vector<16x16xf32>
    %98 = arith.addf %95, %97 : vector<16x16xf32>
    %cst_41 = arith.constant 0.000000e+00 : f32
    %99 = vector.broadcast %cst_41 : f32 to vector<16x16xf32>
    %100 = arith.cmpf oge, %98, %99 : vector<16x16xf32>
    %cst_42 = arith.constant 2.000000e-01 : f32
    %101 = vector.broadcast %cst_42 : f32 to vector<16x16xf32>
    %102 = arith.mulf %101, %98 : vector<16x16xf32>
    %103 = arith.select %100, %98, %102 : vector<16x16xi1>, vector<16x16xf32>
    %cst_43 = arith.constant 5.000000e-01 : f32
    %104 = vector.broadcast %cst_43 : f32 to vector<16x16xf32>
    %105 = arith.cmpf ogt, %0, %104 : vector<16x16xf32>
    %cst_44 = arith.constant -1.000000e+30 : f32
    %106 = vector.broadcast %cst_44 : f32 to vector<16x16xf32>
    %107 = arith.select %105, %103, %106 : vector<16x16xi1>, vector<16x16xf32>
    %cst_45 = arith.constant dense<0xFF800000> : vector<16xf32>
    %108 = vector.multi_reduction <maximumf>, %107, %cst_45 [1] : vector<16x16xf32> to vector<16xf32>
    %109 = vector.shape_cast %108 : vector<16xf32> to vector<16x1xf32>
    %110 = vector.broadcast %109 : vector<16x1xf32> to vector<16x16xf32>
    %111 = arith.subf %107, %110 : vector<16x16xf32>
    %112 = math.exp %111 : vector<16x16xf32>
    %113 = arith.mulf %112, %0 : vector<16x16xf32>
    %cst_46 = arith.constant dense<0.000000e+00> : vector<16xf32>
    %114 = vector.multi_reduction <add>, %113, %cst_46 [1] : vector<16x16xf32> to vector<16xf32>
    %115 = vector.shape_cast %114 : vector<16xf32> to vector<16x1xf32>
    %cst_47 = arith.constant 1.000000e-16 : f32
    %116 = vector.broadcast %cst_47 : f32 to vector<16x1xf32>
    %117 = arith.maximumf %115, %116 : vector<16x1xf32>
    %118 = tpu.reciprocal %117 {approx = true} : vector<16x1xf32> -> vector<16x1xf32>
    %119 = vector.broadcast %118 : vector<16x1xf32> to vector<16x16xf32>
    %120 = arith.mulf %113, %119 : vector<16x16xf32>
    %cst_48 = arith.constant dense<0.000000e+00> : vector<16x16xf32>
    %121 = tpu.matmul %120, %90, %cst_48 {dimension_numbers = #tpu.dot_dimension_numbers<[1], [0], [0], [1], [0, 0, 1, 1], [], []>} : vector<16x16xf32>, vector<16x16xf32>, vector<16x16xf32> -> vector<16x16xf32>
    %122 = vector.broadcast %89 : vector<1x16xf32> to vector<16x16xf32>
    %123 = arith.addf %121, %122 : vector<16x16xf32>
    %cst_49 = arith.constant dense<0.000000e+00> : vector<16xf32>
    %124 = vector.multi_reduction <add>, %123, %cst_49 [0] : vector<16x16xf32> to vector<16xf32>
    %125 = vector.shape_cast %124 : vector<16xf32> to vector<1x16xf32>
    %cst_50 = arith.constant 6.250000e-02 : f32
    %126 = vector.broadcast %cst_50 : f32 to vector<1x16xf32>
    %127 = arith.mulf %125, %126 : vector<1x16xf32>
    %c0_51 = arith.constant 0 : index
    %c0_52 = arith.constant 0 : index
    %128 = vector.load %arg14[%c0_51, %c0_52] : memref<16x1xf32, #tpu.memory_space<vmem>>, vector<16x1xf32>
    %cst_53 = arith.constant dense<0.000000e+00> : vector<1x1xf32>
    %129 = tpu.matmul %127, %128, %cst_53 {dimension_numbers = #tpu.dot_dimension_numbers<[1], [0], [0], [1], [0, 0, 1, 1], [], []>} : vector<1x16xf32>, vector<16x1xf32>, vector<1x1xf32> -> vector<1x1xf32>
    %c0_54 = arith.constant 0 : index
    %c0_55 = arith.constant 0 : index
    %130 = vector.load %arg15[%c0_54, %c0_55] : memref<1x1xf32, #tpu.memory_space<vmem>>, vector<1x1xf32>
    %131 = arith.addf %129, %130 : vector<1x1xf32>
    %c0_56 = arith.constant 0 : index
    %c0_57 = arith.constant 0 : index
    %132 = vector.load %arg16[%c0_56, %c0_57] : memref<1x1xf32, #tpu.memory_space<vmem>>, vector<1x1xf32>
    tpu.vector_store %arg16[%c0_56, %c0_57], %131 {strides = array<i32>} : memref<1x1xf32, #tpu.memory_space<vmem>>, vector<1x1xf32>,
    return
  }
}

</mosaic_0001>

<bundles_post_ra>
// kernel: tpu_custom_call.1
= control target key start
LH: loop header
LB: loop body
LE: loop exit
PB: predicated region body
PF: predicated region fallthrough
CT: control target
= control target key end

     0   :  { %s1801_s0 = inlined_call_operand.vmem [shape: f32[16,8], index: 0, kind: input, shape index: {}]   ;;  %s1802_s1 = inlined_call_operand.vmem [shape: f32[16,16], index: 1, kind: input, shape index: {}]   ;;  %s1803_s2 = inlined_call_operand.vmem [shape: f32[16,16], index: 2, kind: input, shape index: {}]   ;;  %s1804_s3 = inlined_call_operand.vmem [shape: f32[8,32], index: 3, kind: input, shape index: {}]   ;;  %s1805_s4 = inlined_call_operand.vmem [shape: f32[32,4], index: 4, kind: input, shape index: {}]   ;;  %s1806_s5 = inlined_call_operand.vmem [shape: f32[4,32], index: 5, kind: input, shape index: {}]   ;;  %s1807_s6 = inlined_call_operand.vmem [shape: f32[4,1], index: 6, kind: input, shape index: {}]   ;;  %s1808_s7 = inlined_call_operand.vmem [shape: f32[1,32], index: 7, kind: input, shape index: {}]   ;;  %s1809_s8 = inlined_call_operand.vmem [shape: f32[64,32], index: 8, kind: input, shape index: {}]   ;;  %s1810_s9 = inlined_call_operand.vmem [shape: f32[32,16], index: 9, kind: input, shape index: {}]   ;;  %s1811_s10 = inlined_call_operand.vmem [shape: f32[16,1], index: 10, kind: input, shape index: {}]   ;;  %s1812_s11 = inlined_call_operand.vmem [shape: f32[1,16], index: 11, kind: input, shape index: {}]   ;;  %s1813_s12 = inlined_call_operand.<no memory space> [shape: f32[1,1], index: 12, kind: input, shape index: {}]   ;;  %s1814_s13 = inlined_call_operand.vmem [shape: f32[1,16], index: 13, kind: input, shape index: {}]   ;;  %s1815_s14 = inlined_call_operand.vmem [shape: f32[16,1], index: 14, kind: input, shape index: {}]   ;;  %s1816_s16 = inlined_call_operand.hbm [shape: f32[1,1], index: 16, kind: output, shape index: {}]   ;;  %s1817_s15 = inlined_call_operand.<no memory space> [shape: f32[1,1], index: 15, kind: input, shape index: {}]  }
   0x1   :  { %1819 = sst [smem:[#allocation7_spill]] %s1801_s0  ;;  %v21_v0 = vstv %s1813_s12  ;;  %v23_v1 = vstv %s1817_s15 }
   0x2   :  { %22 = vst [vmem:[#allocation2] sm:$0x1] %v21_v0  ;;  %24 = vst [vmem:[#allocation3] sm:$0x1] %v23_v1 }
   0x3   :  { %v64_v2 = vld [vmem:[%s1804_s3] sm:$0xff]  ;;  %s1820_s29 = sld [smem:[#allocation7_spill]]  ;;  %vm80_vm0 = vcmask 64512   ;;  %v66_v6 = vld [vmem:[%s1805_s4 + $0x8] sm:$0xff]  ;;  %v67_v7 = vld [vmem:[%s1805_s4 + $0x10] sm:$0xff] }
   0x4   :  { %1265 = vmatprep.subr.mxu0 %v64_v2  ;;  %v65_v5 = vld [vmem:[%s1805_s4] sm:$0xff]  ;;  %v68_v9 = vld [vmem:[%s1805_s4 + $0x18] sm:$0xff] }
   0x5   :  { %1266 = vmatpush3.msra.mxu0 %v64_v2  ;;  %v1343_v8 = vpack.c.bf16 %v66_v6, %v65_v5 }
   0x9   :  { %v62_v3 = vld [vmem:[%s1820_s29] sm:$0xff]  ;;  %v63_v4 = vld [vmem:[%s1820_s29 + $0x8] sm:$0xff] }
   0xa   :  { %1267 = vmatprep.mubr.msk.f32.mxu0 %vm80_vm0, %v62_v3 }
   0xb   :  { %25 = vsyncpa [#allocation5], 0  ;;  %1268 = vmatmul.mubr.msk.f32.vlgmr.msra.gmra.mrb[0].mxu0 %vm80_vm0, %v63_v4  ;;  %v1347_v10 = vpack.c.bf16 %v68_v9, %v67_v7  ;;  %1344 = vmatprep.subr.bf16.mxu1 %v1343_v8  ;;  %v1470_v11 = vmov 0.0|0.0   ;;  %vm1471_vm1 = vmmov 0   ;;  %v1472_v12 = vmov 0.0   ;;  %v1614_v33 = vld [vmem:[%s1803_s2 + $0x8] sm:$0xff] }
   0xc   :  { %1346 = vmatpush3.bf16.msra.mxu1 %v1343_v8  ;;  %1351 = vmatprep.subr.bf16.mxu0 %v1470_v11  ;;  %v1473_v13 = vmov 1   ;;  %v1474_v14 = vmov 0   ;;  %vm162_vm2 = vcmask 261120   ;;  %v69_v18 = vld [vmem:[%s1806_s5] sm:$0xf]  ;;  %v1475_v26 = vmov 2  }
   0xd   :  { %1348 = vmatprep.subr.bf16.mxu1 %v1347_v10  ;;  %1285 = vmatprep.mubr.msk.f32.mxu0 %vm1471_vm1, %v1472_v12  ;;  %vm1353_vm3 = vmpackc.low %vm162_vm2, %vm162_vm2  ;;  %v70_v19 = vld [vmem:[%s1807_s6] sm:$0xf]  ;;  %v1476_v28 = vmov 3   ;;  %v327_v29 = vlaneseq  ;;  %v1630_v45 = vld [vmem:[%s1802_s1 + $0x8] sm:$0xff]  ;;  %vm441_vm6 = vcmask 130048  }
   0xe   :  { %1399 = vset.pattern.permute.xlu1 %v1473_v13  ;;  %1398 = vset.pattern.permute.xlu0 %v1474_v14  ;;  %1382 = vpush %v70_v19  ;;  %v355_v20 = vrot.slane %v70_v19, 1  ;;  %v377_v21 = vrot.slane %v70_v19, 2  ;;  %v399_v22 = vrot.slane %v70_v19, 3  ;;  %v1623_v38 = vld [vmem:[%s1803_s2] sm:$0xff]  ;;  %vm432_vm4 = vcmp.gt.f32.partialorder %v1630_v45, 0.5  ;;  %vm1373_vm15 = vmpackc.low %vm441_vm6, %vm441_vm6 }
   0xf   :  { %v1607_v30 = vshrl.u32 %v327_v29, 7  ;;  %v1640_v58 = vld [vmem:[%s1802_s1] sm:$0xff] }
  0x10   :  { %1350 = vmatpush3.bf16.msra.mxu1 %v1347_v10  ;;  %1384 = vpush %v355_v20  ;;  %vm431_vm8 = vcmp.gt.f32.partialorder %v1640_v58, 0.5 }
  0x11   :  { %1386 = vpush %v377_v21  ;;  %v351_v31 = vsub.s32 1, %v1607_v30  ;;  %v329_v32 = vsub.s32 0, %v1607_v30  ;;  %v373_v53 = vsub.s32 2, %v1607_v30  ;;  %v395_v54 = vsub.s32 3, %v1607_v30 }
  0x12   :  { %1388 = vpush %v399_v22 }
  0x3f   :  { %s1383_s5 = spop %1382 }
  0x40   :  { %v335_v34 = vstv %s1383_s5 }
  0x41   :  { %s1385_s6 = spop %1384  ;;  %v338_v39 = vmul.f32 %v335_v34, %v1614_v33  ;;  %v337_v46 = vmul.f32 %v335_v34, %v1623_v38 }
  0x42   :  { %v357_v35 = vstv %s1385_s6  ;;  %s1387_s29 = spop %1386 }
  0x43   :  { %v360_v40 = vmul.f32 %v357_v35, %v1614_v33  ;;  %v359_v47 = vmul.f32 %v357_v35, %v1623_v38  ;;  %v379_v50 = vstv %s1387_s29  ;;  %s1389_s17 = spop %1388 }
  0x44   :  { %v381_v59 = vmul.f32 %v379_v50, %v1623_v38  ;;  %v382_v63 = vmul.f32 %v379_v50, %v1614_v33  ;;  %v401_v7 = vstv %s1389_s17 }
  0x45   :  { %v403_v19 = vmul.f32 %v401_v7, %v1623_v38  ;;  %v404_v21 = vmul.f32 %v401_v7, %v1614_v33 }
  0xde   :  { %v1269_v15 = vpop.f32.mrb[0].mxu0 }
  0xdf   :  { %v153_v16 = vpop.f32.mrb[1].mxu0 }
  0xe0   :  { %v1352_v17 = vpack.c.bf16 %v1269_v15, %v153_v16  ;;  %1278 = vmatprep.mubr.msk.f32.mxu1 %vm162_vm2, %v153_v16 }
  0xe1   :  { %1279 = vmatmul.mubr.msk.f32.vlgmr.msra.gmra.mrb[0].mxu1 %vm162_vm2, %v1269_v15 }
  0xe2   :  { %1354 = vmatpush3.bf16.xpose.msk.msra.mxu0 %vm1353_vm3, %v1352_v17  ;;  %1356 = vmatprep.subr.bf16.mxu1 %v1352_v17 }
  0xe3   :  { %1358 = vmatpush3.bf16.msra.mxu1 %v1352_v17 }
  0xe4   :  { %1371 = vmatprep.subr.bf16.mxu1 %v1470_v11 }
  0xe9   :  { %1286 = vmatmul.mubr.msk.f32.vlgmr.msra.gmra.mrb[2].mxu0 %vm162_vm2, %v69_v18 }
 0x1b4   :  { %v1280_v23 = vpop.f32.mrb[0].mxu1 }
 0x1b5   :  { %346 = vperm.xlu1 %1399, %v1280_v23   ;;  %324 = vperm.xlu0 %1398, %v1280_v23   ;;  %v235_v24 = vpop.f32.mrb[1].mxu1 }
 0x1b9   :  { %342 = vperm.xlu1 %1399, %v235_v24   ;;  %319 = vperm.xlu0 %1398, %v235_v24  }
 0x1bc   :  { %v1605_v25 = vpop.f32.mrb[2].mxu0 }
 0x1bd   :  { %1400 = vset.pattern.permute.xlu1 %v1475_v26  ;;  %1401 = vset.pattern.permute.xlu0 %v1475_v26  ;;  %v1287_v27 = vpop.f32.mrb[3].mxu0  ;;  %v352_v36 = vrot.slane %v1605_v25, %v351_v31  ;;  %v330_v37 = vrot.slane %v1605_v25, %v329_v32  ;;  %v374_v1 = vrot.slane %v1605_v25, %v373_v53 }
 0x1be   :  { %368 = vperm.xlu1 %1400, %v1280_v23   ;;  %364 = vperm.xlu0 %1401, %v235_v24  }
 0x1c2   :  { %1402 = vset.pattern.permute.xlu1 %v1476_v28  ;;  %1403 = vset.pattern.permute.xlu0 %v1476_v28 }
 0x1c3   :  { %386 = vperm.xlu1 %1402, %v235_v24   ;;  %390 = vperm.xlu0 %1403, %v1280_v23  }
 0x1c7   :  { %1405 = vset.pattern.permute.xlu1 %v1474_v14  ;;  %1404 = vset.pattern.permute.xlu0 %v1474_v14  ;;  %v396_v14 = vrot.slane %v1605_v25, %v395_v54 }
 0x234   :  { %v347_v41 = vpop.permute.xlu1 %346  ;;  %v325_v42 = vpop.permute.xlu0 %324 }
 0x235   :  { %v354_v43 = vadd.f32 %v352_v36, %v347_v41  ;;  %v332_v44 = vadd.f32 %v330_v37, %v325_v42 }
 0x237   :  { %v362_v48 = vadd.f32 %v360_v40, %v354_v43  ;;  %v340_v49 = vadd.f32 %v338_v39, %v332_v44 }
 0x238   :  { %v343_v51 = vpop.permute.xlu1 %342  ;;  %v320_v52 = vpop.permute.xlu0 %319 }
 0x239   :  { %v353_v55 = vadd.f32 %v352_v36, %v343_v51  ;;  %v331_v56 = vadd.f32 %v330_v37, %v320_v52  ;;  %vm408_vm5 = vcmp.ge.f32.partialorder %v340_v49, 0.0  ;;  %v416_v57 = vmul.f32 0.2, %v340_v49 }
 0x23a   :  { %vm410_vm7 = vcmp.ge.f32.partialorder %v362_v48, 0.0  ;;  %v418_v60 = vmul.f32 0.2, %v362_v48 }
 0x23b   :  { %v361_v61 = vadd.f32 %v359_v47, %v353_v55  ;;  %v339_v62 = vadd.f32 %v337_v46, %v331_v56  ;;  %v424_v0 = vsel %vm408_vm5, %v340_v49, %v416_v57 }
 0x23c   :  { %v434_v2 = vsel %vm432_vm4, %v424_v0, -1e+30  ;;  %v426_v3 = vsel %vm410_vm7, %v362_v48, %v418_v60 }
 0x23d   :  { %v369_v4 = vpop.permute.xlu1 %368  ;;  %v365_v5 = vpop.permute.xlu0 %364  ;;  %v445_v6 = vsel %vm441_vm6, %v434_v2, -inf  ;;  %vm407_vm9 = vcmp.ge.f32.partialorder %v339_v62, 0.0  ;;  %v415_v8 = vmul.f32 0.2, %v339_v62  ;;  %v436_v13 = vsel %vm432_vm4, %v426_v3, -1e+30 }
 0x23e   :  { %v376_v9 = vadd.f32 %v374_v1, %v369_v4  ;;  %v375_v10 = vadd.f32 %v374_v1, %v365_v5  ;;  %446 = vmax.xlane.f32.xlu0 %v445_v6  ;;  %vm409_vm10 = vcmp.ge.f32.partialorder %v361_v61, 0.0  ;;  %v417_v16 = vmul.f32 0.2, %v361_v61 }
 0x23f   :  { %v423_v15 = vsel %vm407_vm9, %v339_v62, %v415_v8  ;;  %v451_v22 = vsel %vm441_vm6, %v436_v13, -inf }
 0x240   :  { %v384_v17 = vadd.f32 %v382_v63, %v376_v9  ;;  %v383_v18 = vadd.f32 %v381_v59, %v375_v10  ;;  %v433_v20 = vsel %vm431_vm8, %v423_v15, -1e+30  ;;  %v425_v24 = vsel %vm409_vm10, %v361_v61, %v417_v16 }
 0x241   :  { %v442_v23 = vsel %vm441_vm6, %v433_v20, -inf  ;;  %v435_v25 = vsel %vm431_vm8, %v425_v24, -1e+30 }
 0x242   :  { %v387_v26 = vpop.permute.xlu1 %386  ;;  %v391_v27 = vpop.permute.xlu0 %390  ;;  %452 = vmax.xlane.f32.xlu0 %v451_v22  ;;  %443 = vmax.xlane.f32.xlu1 %v442_v23  ;;  %vm412_vm11 = vcmp.ge.f32.partialorder %v384_v17, 0.0  ;;  %v420_v28 = vmul.f32 0.2, %v384_v17  ;;  %vm411_vm12 = vcmp.ge.f32.partialorder %v383_v18, 0.0  ;;  %v419_v34 = vmul.f32 0.2, %v383_v18 }
 0x243   :  { %v397_v29 = vadd.f32 %v396_v14, %v387_v26  ;;  %v398_v31 = vadd.f32 %v396_v14, %v391_v27  ;;  %v448_v35 = vsel %vm441_vm6, %v435_v25, -inf }
 0x244   :  { %v428_v36 = vsel %vm412_vm11, %v384_v17, %v420_v28  ;;  %v427_v41 = vsel %vm411_vm12, %v383_v18, %v419_v34 }
 0x245   :  { %v405_v37 = vadd.f32 %v403_v19, %v397_v29  ;;  %v406_v39 = vadd.f32 %v404_v21, %v398_v31  ;;  %v438_v40 = vsel %vm432_vm4, %v428_v36, -1e+30  ;;  %v437_v43 = vsel %vm431_vm8, %v427_v41, -1e+30 }
 0x246   :  { %449 = vmax.xlane.f32.xlu1 %v448_v35  ;;  %v457_v42 = vsel %vm441_vm6, %v438_v40, -inf  ;;  %v454_v47 = vsel %vm441_vm6, %v437_v43, -inf }
 0x247   :  { %458 = vmax.xlane.f32.xlu0 %v457_v42  ;;  %vm414_vm13 = vcmp.ge.f32.partialorder %v406_v39, 0.0  ;;  %v422_v44 = vmul.f32 0.2, %v406_v39  ;;  %vm413_vm14 = vcmp.ge.f32.partialorder %v405_v37, 0.0  ;;  %v421_v46 = vmul.f32 0.2, %v405_v37 }
 0x249   :  { %v430_v48 = vsel %vm414_vm13, %v406_v39, %v422_v44  ;;  %v429_v50 = vsel %vm413_vm14, %v405_v37, %v421_v46 }
 0x24a   :  { %455 = vmax.xlane.f32.xlu1 %v454_v47  ;;  %v440_v49 = vsel %vm432_vm4, %v430_v48, -1e+30  ;;  %v439_v52 = vsel %vm431_vm8, %v429_v50, -1e+30 }
 0x24b   :  { %v463_v51 = vsel %vm441_vm6, %v440_v49, -inf  ;;  %v460_v53 = vsel %vm441_vm6, %v439_v52, -inf }
 0x24c   :  { %464 = vmax.xlane.f32.xlu0 %v463_v51 }
 0x24e   :  { %461 = vmax.xlane.f32.xlu1 %v460_v53 }
 0x2cb   :  { %v447_v54 = vpop.xlane.xlu0 %446 }
 0x2cc   :  { %v467_v55 = vsub.f32 %v434_v2, %v447_v54 }
 0x2ce   :  { %v476_v56 = vmul.f32 1.442695, %v467_v55 }
 0x2cf   :  { %v453_v57 = vpop.xlane.xlu0 %452  ;;  %v444_v59 = vpop.xlane.xlu1 %443 }
 0x2d0   :  { %1406 = vpow2.f32 %v476_v56  ;;  %v469_v60 = vsub.f32 %v436_v13, %v453_v57  ;;  %v466_v61 = vsub.f32 %v433_v20, %v444_v59 }
 0x2d2   :  { %v480_v62 = vmul.f32 1.442695, %v469_v60  ;;  %v474_v63 = vmul.f32 1.442695, %v466_v61 }
 0x2d3   :  { %v450_v0 = vpop.xlane.xlu1 %449 }
 0x2d4   :  { %1408 = vpow2.f32 %v480_v62  ;;  %v468_v1 = vsub.f32 %v435_v25, %v450_v0  ;;  %v459_v3 = vpop.xlane.xlu0 %458 }
 0x2d5   :  { %1410 = vpow2.f32 %v474_v63  ;;  %v471_v4 = vsub.f32 %v438_v40, %v459_v3 }
 0x2d6   :  { %v478_v5 = vmul.f32 1.442695, %v468_v1 }
 0x2d7   :  { %v484_v6 = vmul.f32 1.442695, %v471_v4  ;;  %v456_v7 = vpop.xlane.xlu1 %455 }
 0x2d8   :  { %1412 = vpow2.f32 %v478_v5  ;;  %v470_v8 = vsub.f32 %v437_v43, %v456_v7 }
 0x2d9   :  { %1414 = vpow2.f32 %v484_v6  ;;  %v465_v2 = vpop.xlane.xlu0 %464 }
 0x2da   :  { %v1407_v9 = vpop.eup %1406  ;;  %v482_v10 = vmul.f32 1.442695, %v470_v8  ;;  %v473_v14 = vsub.f32 %v440_v49, %v465_v2 }
 0x2db   :  { %v462_v13 = vpop.xlane.xlu1 %461  ;;  %v1674_v15 = vmul.f32 %v1407_v9, %v1630_v45 }
 0x2dc   :  { %1416 = vpow2.f32 %v482_v10  ;;  %v488_v16 = vmul.f32 1.442695, %v473_v14  ;;  %v472_v17 = vsub.f32 %v439_v52, %v462_v13 }
 0x2dd   :  { %v501_v18 = vsel %vm441_vm6, %v1674_v15, 0.0 }
 0x2de   :  { %v1409_v19 = vpop.eup %1408  ;;  %1418 = vpow2.f32 %v488_v16  ;;  %v486_v20 = vmul.f32 1.442695, %v472_v17  ;;  %502 = vadd.xlane.f32.xlu0 %v501_v18  ;;  %v699_v17 = vld [vmem:[%s1810_s9] sm:$0xff]  ;;  %v700_v18 = vld [vmem:[%s1810_s9 + $0x8] sm:$0xff] }
 0x2df   :  { %v1411_v21 = vpop.eup %1410  ;;  %v493_v22 = vmul.f32 %v1409_v19, %v1630_v45  ;;  %v1359_v19 = vpack.c.bf16 %v700_v18, %v699_v17 }
 0x2e0   :  { %1420 = vpow2.f32 %v486_v20  ;;  %v490_v23 = vmul.f32 %v1411_v21, %v1640_v58  ;;  %v701_v20 = vld [vmem:[%s1810_s9 + $0x10] sm:$0xff]  ;;  %v702_v21 = vld [vmem:[%s1810_s9 + $0x18] sm:$0xff] }
 0x2e1   :  { %v507_v24 = vsel %vm441_vm6, %v493_v22, 0.0  ;;  %1360 = vmatprep.subr.bf16.mxu0 %v1359_v19 }
 0x2e2   :  { %v1413_v26 = vpop.eup %1412  ;;  %508 = vadd.xlane.f32.xlu0 %v507_v24  ;;  %v498_v27 = vsel %vm441_vm6, %v490_v23, 0.0  ;;  %1362 = vmatpush3.bf16.msra.mxu0 %v1359_v19  ;;  %v704_v24 = vld [vmem:[%s1811_s10 + $0x8] sm:$0xff] }
 0x2e3   :  { %v1415_v25 = vpop.eup %1414  ;;  %499 = vadd.xlane.f32.xlu1 %v498_v27  ;;  %v492_v28 = vmul.f32 %v1413_v26, %v1640_v58 }
 0x2e4   :  { %v495_v29 = vmul.f32 %v1415_v25, %v1630_v45 }
 0x2e5   :  { %v504_v31 = vsel %vm441_vm6, %v492_v28, 0.0 }
 0x2e6   :  { %v1417_v34 = vpop.eup %1416  ;;  %v513_v35 = vsel %vm441_vm6, %v495_v29, 0.0 }
 0x2e7   :  { %505 = vadd.xlane.f32.xlu1 %v504_v31  ;;  %514 = vadd.xlane.f32.xlu0 %v513_v35  ;;  %v494_v36 = vmul.f32 %v1417_v34, %v1640_v58  ;;  %v72_v31 = vld [vmem:[%s1809_s8] sm:$0xff]  ;;  %v74_v34 = vld [vmem:[%s1809_s8 + $0x10] sm:$0xff] }
 0x2e8   :  { %v1419_v37 = vpop.eup %1418 }
 0x2e9   :  { %v510_v39 = vsel %vm441_vm6, %v494_v36, 0.0  ;;  %v497_v40 = vmul.f32 %v1419_v37, %v1630_v45 }
 0x2ea   :  { %v1421_v41 = vpop.eup %1420 }
 0x2eb   :  { %511 = vadd.xlane.f32.xlu1 %v510_v39  ;;  %v519_v42 = vsel %vm441_vm6, %v497_v40, 0.0  ;;  %v496_v43 = vmul.f32 %v1421_v41, %v1640_v58 }
 0x2ec   :  { %520 = vadd.xlane.f32.xlu0 %v519_v42  ;;  %v77_v42 = vld [vmem:[%s1809_s8 + $0x28] sm:$0xff] }
 0x2ed   :  { %v516_v44 = vsel %vm441_vm6, %v496_v43, 0.0 }
 0x2ef   :  { %517 = vadd.xlane.f32.xlu1 %v516_v44  ;;  %v76_v44 = vld [vmem:[%s1809_s8 + $0x20] sm:$0xff] }
 0x36b   :  { %v503_v46 = vpop.xlane.xlu0 %502 }
 0x36c   :  { %v523_v47 = vmax.f32 %v503_v46, 1e-16 }
 0x36e   :  { %1422 = vrcp.f32 %v523_v47 }
 0x36f   :  { %v509_v48 = vpop.xlane.xlu0 %508 }
 0x370   :  { %v500_v49 = vpop.xlane.xlu1 %499  ;;  %v525_v51 = vmax.f32 %v509_v48, 1e-16 }
 0x371   :  { %v522_v50 = vmax.f32 %v500_v49, 1e-16 }
 0x373   :  { %1424 = vrcp.f32 %v522_v50 }
 0x374   :  { %v506_v52 = vpop.xlane.xlu1 %505  ;;  %v515_v53 = vpop.xlane.xlu0 %514  ;;  %1426 = vrcp.f32 %v525_v51  ;;  %v79_v51 = vld [vmem:[%s1809_s8 + $0x38] sm:$0xff] }
 0x375   :  { %v524_v54 = vmax.f32 %v506_v52, 1e-16  ;;  %v527_v55 = vmax.f32 %v515_v53, 1e-16  ;;  %v78_v53 = vld [vmem:[%s1809_s8 + $0x30] sm:$0xff] }
 0x377   :  { %1428 = vrcp.f32 %v524_v54 }
 0x378   :  { %v512_v56 = vpop.xlane.xlu1 %511  ;;  %1430 = vrcp.f32 %v527_v55  ;;  %v1423_v61 = vpop.eup %1422 }
 0x379   :  { %v526_v57 = vmax.f32 %v512_v56, 1e-16  ;;  %v521_v59 = vpop.xlane.xlu0 %520  ;;  %v539_v3 = vmul.f32 %v1423_v61, %v1674_v15 }
 0x37a   :  { %v529_v60 = vmax.f32 %v521_v59, 1e-16  ;;  %v1210_v59 = vld [vmem:[%s1808_s7] ss:$0 sm:$0xff] }
 0x37b   :  { %1432 = vrcp.f32 %v526_v57 }
 0x37c   :  { %v518_v62 = vpop.xlane.xlu1 %517  ;;  %1434 = vrcp.f32 %v529_v60 }
 0x37d   :  { %v1425_v63 = vpop.eup %1424  ;;  %v528_v0 = vmax.f32 %v518_v62, 1e-16 }
 0x37e   :  { %v538_v1 = vmul.f32 %v1425_v63, %v490_v23  ;;  %v1427_v4 = vpop.eup %1426  ;;  %v703_v23 = vld [vmem:[%s1811_s10] sm:$0xff] }
 0x37f   :  { %1436 = vrcp.f32 %v528_v0  ;;  %v541_v7 = vmul.f32 %v1427_v4, %v493_v22  ;;  %v1363_v22 = vpack.c.bf16 %v702_v21, %v701_v20  ;;  %v1367_v26 = vpack.c.bf16 %v704_v24, %v703_v23 }
 0x380   :  { %1292 = vmatprep.mubr.msk.f32.mxu1 %vm441_vm6, %v538_v1 }
 0x381   :  { %v1429_v5 = vpop.eup %1428  ;;  %1293 = vmatmul.mubr.msk.f32.vlgmr.msra.gmra.mrb[2].mxu1 %vm441_vm6, %v539_v3  ;;  %1364 = vmatprep.subr.bf16.mxu0 %v1363_v22 }
 0x382   :  { %v540_v6 = vmul.f32 %v1429_v5, %v492_v28  ;;  %v1431_v8 = vpop.eup %1430  ;;  %1366 = vmatpush3.bf16.msra.mxu0 %v1363_v22  ;;  %v73_v28 = vld [vmem:[%s1809_s8 + $0x8] sm:$0xff] }
 0x383   :  { %v543_v10 = vmul.f32 %v1431_v8, %v495_v29  ;;  %1368 = vmatprep.subr.bf16.mxu0 %v1367_v26  ;;  %v75_v29 = vld [vmem:[%s1809_s8 + $0x18] sm:$0xff]  ;;  %v1218_v8 = vld [vmem:[#allocation2] ss:$0 sm:$0xff] }
 0x384   :  { %1295 = vmatprep.mubr.msk.f32.mxu1 %vm441_vm6, %v540_v6  ;;  %965 = vperm.xlu0 %1404, %v1218_v8  }
 0x385   :  { %v1433_v2 = vpop.eup %1432  ;;  %1296 = vmatmul.mubr.msk.f32.gmra.mrb[4].mxu1 %vm441_vm6, %v541_v7  ;;  %v705_v7 = vld [vmem:[%s1812_s11] sm:$0x1] }
 0x386   :  { %v542_v9 = vmul.f32 %v1433_v2, %v494_v36  ;;  %v1435_v14 = vpop.eup %1434 }
 0x387   :  { %v545_v16 = vmul.f32 %v1435_v14, %v497_v40 }
 0x388   :  { %1298 = vmatprep.mubr.msk.f32.mxu1 %vm441_vm6, %v542_v9 }
 0x389   :  { %v1437_v13 = vpop.eup %1436  ;;  %1299 = vmatmul.mubr.msk.f32.gmra.mrb[6].mxu1 %vm441_vm6, %v543_v10 }
 0x38a   :  { %v544_v15 = vmul.f32 %v1437_v13, %v496_v43 }
 0x38c   :  { %1301 = vmatprep.mubr.msk.f32.mxu1 %vm441_vm6, %v544_v15 }
 0x38d   :  { %1302 = vmatmul.mubr.msk.f32.gmra.mrb[8].mxu1 %vm441_vm6, %v545_v16 }
 0x38e   :  { %1326 = vmatprep.mubr.msk.f32.mxu1 %vm1471_vm1, %v1472_v12 }
 0x403   :  { %v966_v13 = vpop.permute.xlu0 %965 }
 0x404   :  { %v969_v20 = vmul.f32 %v966_v13, %v1614_v33 }
 0x454   :  { %v1294_v27 = vpop.f32.mrb[2].mxu1 }
 0x455   :  { %v636_v25 = vpop.f32.mrb[3].mxu1  ;;  %v676_v36 = vmul.f32 %v1294_v27, %v73_v28 }
 0x456   :  { %v675_v40 = vmul.f32 %v636_v25, %v72_v31 }
 0x458   :  { %v1297_v35 = vpop.f32.mrb[4].mxu1 }
 0x459   :  { %v678_v37 = vmul.f32 %v1297_v35, %v75_v29  ;;  %v646_v39 = vpop.f32.mrb[5].mxu1 }
 0x45a   :  { %v677_v41 = vmul.f32 %v646_v39, %v74_v34 }
 0x45b   :  { %v684_v43 = vadd.f32 %v678_v37, %v676_v36 }
 0x45c   :  { %v683_v46 = vadd.f32 %v677_v41, %v675_v40  ;;  %v1300_v47 = vpop.f32.mrb[6].mxu1 }
 0x45d   :  { %v680_v48 = vmul.f32 %v1300_v47, %v77_v42  ;;  %v656_v49 = vpop.f32.mrb[7].mxu1 }
 0x45e   :  { %v679_v50 = vmul.f32 %v656_v49, %v76_v44 }
 0x45f   :  { %v686_v52 = vadd.f32 %v684_v43, %v680_v48 }
 0x460   :  { %v685_v54 = vadd.f32 %v683_v46, %v679_v50  ;;  %v1303_v55 = vpop.f32.mrb[8].mxu1 }
 0x461   :  { %v682_v56 = vmul.f32 %v1303_v55, %v79_v51  ;;  %v666_v57 = vpop.f32.mrb[9].mxu1  ;;  %v1104_v51 = vld [vmem:[%s1815_s14 + $0x8] sm:$0xff] }
 0x462   :  { %v681_v60 = vmul.f32 %v666_v57, %v78_v53  ;;  %v1219_v53 = vld [vmem:[%s1814_s13] ss:$0 sm:$0xff]  ;;  %s1477_s13 = smov [#allocation4]  }
 0x463   :  { %v688_v61 = vadd.f32 %v686_v52, %v682_v56 }
 0x464   :  { %v687_v62 = vadd.f32 %v685_v54, %v681_v60 }
 0x465   :  { %v696_v63 = vadd.f32 %v1210_v59, %v688_v61 }
 0x466   :  { %v695_v0 = vadd.f32 %v1210_v59, %v687_v62 }
 0x467   :  { %v698_v3 = vmax.f32 %v696_v63, 0.0 }
 0x468   :  { %v697_v1 = vmax.f32 %v695_v0, 0.0 }
 0x46a   :  { %1312 = vmatprep.mubr.msk.f32.mxu0 %vm162_vm2, %v697_v1 }
 0x46b   :  { %1313 = vmatmul.mubr.msk.f32.vlgmr.msra.gmra.mrb[4].mxu0 %vm162_vm2, %v698_v3 }
 0x46c   :  { %1370 = vmatpush3.bf16.msra.mxu0 %v1367_v26 }
 0x53e   :  { %v1314_v4 = vpop.f32.mrb[4].mxu0 }
 0x53f   :  { %v780_v5 = vpop.f32.mrb[5].mxu0 }
 0x540   :  { %v1372_v6 = vpack.c.bf16 %v1314_v4, %v780_v5  ;;  %1319 = vmatprep.mubr.msk.f32.mxu0 %vm441_vm6, %v780_v5  ;;  %v1105_v5 = vld [vmem:[#allocation3] sm:$0x1] }
 0x541   :  { %1320 = vmatmul.mubr.msk.f32.vlgmr.msra.gmra.mrb[6].mxu0 %vm441_vm6, %v1314_v4 }
 0x542   :  { %1374 = vmatpush3.bf16.xpose.msk.msra.mxu1 %vm1373_vm15, %v1372_v6  ;;  %1376 = vmatprep.subr.bf16.mxu0 %v1372_v6 }
 0x543   :  { %1378 = vmatpush3.bf16.msra.mxu0 %v1372_v6 }
 0x544   :  { %1379 = vmatprep.subr.bf16.mxu0 %v1470_v11  ;;  %v968_v11 = vmul.f32 %v966_v13, %v1623_v38 }
 0x549   :  { %1327 = vmatmul.mubr.msk.f32.vlgmr.msra.gmra.mrb[10].mxu1 %vm441_vm6, %v705_v7 }
 0x614   :  { %v1321_v2 = vpop.f32.mrb[6].mxu0 }
 0x615   :  { %v861_v9 = vpop.f32.mrb[7].mxu0 }
 0x616   :  { %945 = vperm.xlu1 %1405, %v861_v9  }
 0x61a   :  { %950 = vperm.xlu1 %1405, %v1321_v2  }
 0x61c   :  { %v939_v10 = vpop.f32.mrb[10].mxu1 }
 0x61d   :  { %v1328_v14 = vpop.f32.mrb[11].mxu1  ;;  %v956_v15 = vrot.slane %v939_v10, %v329_v32 }
 0x695   :  { %v946_v16 = vpop.permute.xlu1 %945 }
 0x696   :  { %v957_v17 = vadd.f32 %v956_v15, %v946_v16 }
 0x698   :  { %v970_v18 = vadd.f32 %v968_v11, %v957_v17 }
 0x699   :  { %v951_v19 = vpop.permute.xlu1 %950 }
 0x69a   :  { %v958_v21 = vadd.f32 %v956_v15, %v951_v19  ;;  %vm972_vm0 = vcmp.ge.f32.partialorder %v970_v18, 0.0  ;;  %v974_v22 = vmul.f32 0.2, %v970_v18 }
 0x69c   :  { %v971_v23 = vadd.f32 %v969_v20, %v958_v21  ;;  %v976_v24 = vsel %vm972_vm0, %v970_v18, %v974_v22 }
 0x69d   :  { %v978_v26 = vsel %vm431_vm8, %v976_v24, -1e+30 }
 0x69e   :  { %v980_v27 = vsel %vm441_vm6, %v978_v26, -inf  ;;  %vm973_vm2 = vcmp.ge.f32.partialorder %v971_v23, 0.0  ;;  %v975_v30 = vmul.f32 0.2, %v971_v23 }
 0x69f   :  { %981 = vmax.xlane.f32.xlu1 %v980_v27 }
 0x6a0   :  { %v977_v32 = vsel %vm973_vm2, %v971_v23, %v975_v30 }
 0x6a1   :  { %v979_v38 = vsel %vm432_vm4, %v977_v32, -1e+30 }
 0x6a2   :  { %v983_v25 = vsel %vm441_vm6, %v979_v38, -inf }
 0x6a3   :  { %984 = vmax.xlane.f32.xlu0 %v983_v25 }
 0x72c   :  { %v982_v33 = vpop.xlane.xlu1 %981 }
 0x72d   :  { %v986_v28 = vsub.f32 %v978_v26, %v982_v33 }
 0x72f   :  { %v988_v29 = vmul.f32 1.442695, %v986_v28 }
 0x730   :  { %v985_v31 = vpop.xlane.xlu0 %984 }
 0x731   :  { %1438 = vpow2.f32 %v988_v29  ;;  %v987_v34 = vsub.f32 %v979_v38, %v985_v31 }
 0x733   :  { %v990_v35 = vmul.f32 1.442695, %v987_v34 }
 0x735   :  { %1440 = vpow2.f32 %v990_v35 }
 0x73b   :  { %v1439_v36 = vpop.eup %1438 }
 0x73c   :  { %v992_v37 = vmul.f32 %v1439_v36, %v1640_v58 }
 0x73e   :  { %v994_v39 = vsel %vm441_vm6, %v992_v37, 0.0 }
 0x73f   :  { %v1441_v40 = vpop.eup %1440  ;;  %995 = vadd.xlane.f32.xlu1 %v994_v39 }
 0x740   :  { %v993_v41 = vmul.f32 %v1441_v40, %v1630_v45  ;;  %v1103_v45 = vld [vmem:[%s1815_s14] sm:$0xff]  ;;  %s1187_s14 = sshll.u32 %s1477_s13, 4  ;;  %s1188_s14 = int_to_ptr.vmem [resolvable:$true] %s1187_s14 }
 0x741   :  { %v1380_v52 = vpack.c.bf16 %v1104_v51, %v1103_v45  ;;  %s1446_s24 = scalar_lea.vmem %s1188_s14, 16  ;;  %s1450_s5 = scalar_lea.vmem %s1188_s14, 32 }
 0x742   :  { %v997_v42 = vsel %vm441_vm6, %v993_v41, 0.0  ;;  %p1447_p0 = scmp.ne.s32.totalorder %s1188_s14, %s1446_s24  ;;  %p1451_p1 = scmp.lt.s32.totalorder %s1188_s14, %s1188_s14 }
 0x743   :  { %998 = vadd.xlane.f32.xlu1 %v997_v42  ;;  %p1452_p2 = scmp.lt.s32.totalorder %s1450_s5, %s1446_s24 }
 0x745   :  { %p1453_p3 = por %p1452_p2, %p1451_p1 }
 0x747   :  { %p1454_p4 = pnand %p1453_p3, %p1447_p0 }
 0x7cc   :  { %v996_v43 = vpop.xlane.xlu1 %995 }
 0x7cd   :  { %v1000_v44 = vmax.f32 %v996_v43, 1e-16 }
 0x7cf   :  { %1442 = vrcp.f32 %v1000_v44 }
 0x7d0   :  { %v999_v46 = vpop.xlane.xlu1 %998 }
 0x7d1   :  { %v1001_v47 = vmax.f32 %v999_v46, 1e-16 }
 0x7d3   :  { %1444 = vrcp.f32 %v1001_v47 }
 0x7d9   :  { %v1443_v48 = vpop.eup %1442 }
 0x7da   :  { %v1004_v49 = vmul.f32 %v1443_v48, %v992_v37 }
 0x7dc   :  { %1333 = vmatprep.mubr.msk.f32.mxu0 %vm441_vm6, %v1004_v49 }
 0x7dd   :  { %v1445_v58 = vpop.eup %1444 }
 0x7de   :  { %v1005_v50 = vmul.f32 %v1445_v58, %v993_v41 }
 0x7e0   :  { %1334 = vmatmul.mubr.msk.f32.vlgmr.msra.gmra.mrb[8].mxu0 %vm441_vm6, %v1005_v50 }
 0x7e1   :  { %1340 = vmatprep.mubr.msk.f32.mxu0 %vm1471_vm1, %v1472_v12  ;;  %1381 = vmatpush3.bf16.msra.mxu0 %v1380_v52  ;;  %vm1179_vm1 = vcmask 0  }
 0x8b3   :  { %v1335_v54 = vpop.f32.mrb[8].mxu0 }
 0x8b4   :  { %v1090_v55 = vadd.f32 %v1335_v54, %v1219_v53  ;;  %v1084_v56 = vpop.f32.mrb[9].mxu0 }
 0x8b5   :  { %v1085_v57 = vadd.f32 %v1219_v53, %v1084_v56 }
 0x8b6   :  { %v1094_v12 = vsel %vm441_vm6, %v1090_v55, 0.0 }
 0x8b7   :  { %v1093_v59 = vsel %vm441_vm6, %v1085_v57, 0.0 }
 0x8b8   :  { %v1095_v60 = vadd.f32 %v1094_v12, %v1093_v59 }
 0x8ba   :  { %v1096_v61 = vrot.slane %v1095_v60, 4 }
 0x8bc   :  { %v1097_v62 = vadd.f32 %v1096_v61, %v1095_v60 }
 0x8be   :  { %v1098_v63 = vrot.slane %v1097_v62, 2 }
 0x8c0   :  { %v1099_v0 = vadd.f32 %v1098_v63, %v1097_v62 }
 0x8c2   :  { %v1100_v1 = vrot.slane %v1099_v0, 1 }
 0x8c4   :  { %v1101_v3 = vadd.f32 %v1100_v1, %v1099_v0 }
 0x8c6   :  { %v1102_v4 = vmul.f32 0.0625, %v1101_v3 }
 0x8c8   :  { %1341 = vmatmul.mubr.msk.f32.vlgmr.msra.gmra.mrb[10].mxu0 %vm441_vm6, %v1102_v4 }
 0x99b   :  { %v1175_v6 = vpop.f32.mrb[10].mxu0 }
 0x99c   :  { %v1176_v7 = vadd.f32 %v1175_v6, %v1105_v5  ;;  %v1342_v8 = vpop.f32.mrb[11].mxu0 }
 0x99e   :  { %1180 = vst.msk [vmem:[#allocation4] sm:$0x1] %vm1179_vm1, %v1176_v7 }
 0x99f   :  { %1457 = shalt.err (!%p1454_p4)
}
 0x9a0   :  { %s1458_s9 = scalar_lea.hbm %s1816_s16, 16 }
 0x9a1   :  { %p1459_p5 = scmp.ne.s32.totalorder %s1816_s16, %s1458_s9  ;;  %p1462_p6 = scmp.lt.u32.totalorder %s1458_s9, %s1816_s16 }
 0x9a3   :  { %p1464_p7 = pnand %p1462_p6, %p1459_p5 }
 0x9a5   :  { %1467 = shalt.err (!%p1464_p7)
}
 0x9a6   :  { %1190 = dma.vmem_to_hbm [thread:$0]  %s1188_s14, 16, %s1816_s16, [#allocation5]  }
 0x9a7   :  { %1468 = dma.done.wait [#allocation5], 16  }
 0x9a8   :  { %1469 = vsyncadd [#allocation5], 4294967280 }
 0x9a9   :  { %1194 = vsyncpa [#allocation5], 1 }

</bundles_post_ra>
